<compile_context>
chip_gen: v7x
topology: tpu7x:2x2x1
jax: 0.10.0
libtpu: 0.0.40
codegen_flags: <defaults>
</compile_context>

<pallas_src>
import math

import jax
import jax.numpy as jnp
from jax import lax
from jax.experimental import pallas as pl
from jax.experimental.pallas import tpu as pltpu


def _round_up(x, m):
    return ((x + m - 1) // m) * m


def _pick_row_tile(m, max_tile=1024):
    """Largest multiple-of-8 divisor of m <= max_tile.

    Prefers >= 2 grid steps (keeps both v7x TensorCores busy) and 256/128-row
    alignment (v6e/v7x MXU is 256x256).  Returns None if no divisor exists.
    """
    divisors = [d for d in range(8, min(max_tile, m) + 1, 8) if m % d == 0]
    if not divisors:
        return None
    cands = [d for d in divisors if m // d >= 2] or divisors
    for align in (256, 128, 16, 8):
        aligned = [d for d in cands if d % align == 0]
        if aligned:
            return max(aligned)
    return max(cands)


# ----------------------------------------------------------------------------
# Pallas kernels
# ----------------------------------------------------------------------------
def _fused_backbone_fpn_kernel(p_ref, w1_ref, b1_ref, w2_ref, b2_ref, o_ref):
    # patches @ Wconv -> ReLU -> @ Wfpn -> ReLU, all in one VMEM-resident tile.
    h = jnp.dot(p_ref[...], w1_ref[...], preferred_element_type=jnp.float32)
    h = jnp.maximum(h + b1_ref[...], 0.0)
    f = jnp.dot(h.astype(jnp.bfloat16), w2_ref[...],
                preferred_element_type=jnp.float32)
    f = jnp.maximum(f + b2_ref[...], 0.0)
    o_ref[...] = f.astype(o_ref.dtype)


def pallas_backbone_fpn(patches, w1, b1, w2, b2):
    """patches: (M, K) bf16, w1: (K, Hp) bf16, w2: (Hp, Dp) bf16 -> (M, Dp) bf16."""
    M, K = patches.shape
    Hp = w1.shape[1]
    Dp = w2.shape[1]

    # Row-tile so Pallas double-buffers HBM->VMEM and overlaps DMA with the MXU.
    TM = _pick_row_tile(M)
    pad_rows = 0
    if TM is None:                      # fallback only: M not a multiple of 8
        TM = min(1024, _round_up(M, 8))
        pad_rows = _round_up(M, TM) - M
        patches = jnp.pad(patches, ((0, pad_rows), (0, 0)))
    Mp = M + pad_rows

    cost = pl.CostEstimate(
        flops=2 * Mp * K * Hp + 2 * Mp * Hp * Dp,
        transcendentals=0,
        bytes_accessed=(Mp * K + K * Hp + Hp * Dp + Mp * Dp) * 2 + (Hp + Dp) * 4)

    out = pl.pallas_call(
        _fused_backbone_fpn_kernel,
        out_shape=jax.ShapeDtypeStruct((Mp, Dp), jnp.bfloat16),
        grid=(Mp // TM,),
        in_specs=[
            pl.BlockSpec((TM, K), lambda i: (i, 0)),
            pl.BlockSpec((K, Hp), lambda i: (0, 0)),
            pl.BlockSpec((1, Hp), lambda i: (0, 0)),
            pl.BlockSpec((Hp, Dp), lambda i: (0, 0)),
            pl.BlockSpec((1, Dp), lambda i: (0, 0)),
        ],
        out_specs=pl.BlockSpec((TM, Dp), lambda i: (i, 0)),
        compiler_params=pltpu.CompilerParams(
            dimension_semantics=("parallel",),
            vmem_limit_bytes=32 * 1024 * 1024),
        cost_estimate=cost,
    )(patches, w1, b1, w2, b2)
    return out if pad_rows == 0 else out[:M]


def pallas_head(test_feat, train_feat, mask_bias, w_head, b_head, *, d_real):
    """Cross-attention head + fused (cls|reg) projection.

    test_feat : (B, Ntp, Dp) bf16 search tokens (queries), Ntp multiple of 128
    train_feat: (B, Nsp, Dp) bf16 template tokens (keys/values), zero-padded
    mask_bias : (1, Nsp)     f32  additive bias (0 valid / -1e30 padded token)
    w_head    : (Dp, Nh)     bf16 fused [w_cls | w_reg | 0-pad] projection
    b_head    : (1, Nh)      f32
    returns (B, Ntp, Nh) f32 (caller slices real queries + cls / reg lanes)
    """
    B, Ntp, Dp = test_feat.shape
    _, Nsp, _ = train_feat.shape
    Nh = w_head.shape[1]
    scale = 1.0 / math.sqrt(d_real)

    # 256-row query tiles when they come for free (v6e/v7x MXU), else 128.
    TQ = 256 if (Ntp >= 256 and Ntp % 256 == 0) else 128
    assert Ntp % TQ == 0

    def kernel(q_ref, kv_ref, bias_ref, w_ref, b_ref, o_ref):
        q = q_ref[...]                                    # (TQ, Dp)  bf16
        kv = kv_ref[...]                                  # (Nsp, Dp) bf16
        # q . kv^T without an explicit transpose (contract dim 1 of both).
        s = lax.dot_general(q, kv, (((1,), (1,)), ((), ())),
                            preferred_element_type=jnp.float32) * scale  # (TQ, Nsp)
        s = s + bias_ref[...]                             # mask padded template tokens
        m = jnp.max(s, axis=-1, keepdims=True)
        p = jnp.exp(s - m)
        inv_l = pl.reciprocal(jnp.sum(p, axis=-1, keepdims=True), approx=True)
        p = p * inv_l                                     # softmax over template tokens
        attn = jnp.dot(p.astype(jnp.bfloat16), kv,
                       preferred_element_type=jnp.float32)      # (TQ, Dp) f32
        feat = q.astype(jnp.float32) + attn               # residual
        o_ref[...] = (jnp.dot(feat.astype(jnp.bfloat16), w_ref[...],
                              preferred_element_type=jnp.float32) + b_ref[...])

    cost = pl.CostEstimate(
        flops=B * Ntp * (4 * Nsp * Dp + 2 * Dp * Nh),
        transcendentals=B * Ntp * Nsp,
        bytes_accessed=(B * Ntp * Dp + B * Nsp * Dp + Dp * Nh) * 2
                       + (Nsp + Nh) * 4 + B * Ntp * Nh * 4)

    return pl.pallas_call(
        kernel,
        out_shape=jax.ShapeDtypeStruct((B, Ntp, Nh), jnp.float32),
        grid=(B, Ntp // TQ),
        in_specs=[
            pl.BlockSpec((None, TQ, Dp), lambda b, qi: (b, qi, 0)),
            pl.BlockSpec((None, Nsp, Dp), lambda b, qi: (b, 0, 0)),
            pl.BlockSpec((1, Nsp), lambda b, qi: (0, 0)),
            pl.BlockSpec((Dp, Nh), lambda b, qi: (0, 0)),
            pl.BlockSpec((1, Nh), lambda b, qi: (0, 0)),
        ],
        out_specs=pl.BlockSpec((None, TQ, Nh), lambda b, qi: (b, qi, 0)),
        compiler_params=pltpu.CompilerParams(
            dimension_semantics=("parallel", "parallel"),
            vmem_limit_bytes=32 * 1024 * 1024),
        cost_estimate=cost,
    )(test_feat, train_feat, mask_bias, w_head, b_head)


# ----------------------------------------------------------------------------
# Glue (im2col, padding, parameter plumbing) in plain JAX
# ----------------------------------------------------------------------------
def im2col(x, k=3, stride=2, pad=1):
    """x: (B, C, H, W) NCHW -> patches (B*Ho*Wo, C*k*k), ordered (Cin, kh, kw)."""
    # TODO(synk): fuse im2col into the backbone kernel (memory_space=pl.ANY +
    # manual stride-2 row-window DMA) to avoid the ~2.25x patch materialization
    # in HBM at realistic SiamTPN resolutions.
    B, C, H, W = x.shape
    xp = jnp.pad(x, ((0, 0), (0, 0), (pad, pad), (pad, pad)))
    Ho = (H + 2 * pad - k) // stride + 1
    Wo = (W + 2 * pad - k) // stride + 1
    cols = []
    for i in range(k):
        for j in range(k):
            cols.append(xp[:, :, i:i + stride * Ho:stride, j:j + stride * Wo:stride])
    patches = jnp.stack(cols, axis=2)                  # (B, C, k*k, Ho, Wo)
    patches = patches.transpose(0, 3, 4, 1, 2)          # (B, Ho, Wo, C, k*k)
    return patches.reshape(B * Ho * Wo, C * k * k), Ho, Wo


def siamtpn_forward(train_imgs, test_img, params):
    """train_imgs: (num_images, B, C, H, W), test_img: (B, C, H, W)."""
    num_images, B, C, H, W = train_imgs.shape

    # Batch templates as (B, num_images, ...) so the per-batch template feature
    # split after the backbone is a pure reshape (no HBM transpose pass).
    train_batched = jnp.transpose(train_imgs, (1, 0, 2, 3, 4)).reshape(
        B * num_images, C, H, W)
    x_all = jnp.concatenate([train_batched, test_img], axis=0).astype(jnp.bfloat16)

    patches, Ho, Wo = im2col(x_all)                     # ((B*ni+B)*Ntok, C*9) bf16
    Ntok = Ho * Wo

    hidden = params["w_conv"].shape[0]
    D = params["w_fpn"].shape[1]
    K = patches.shape[1]                                # C*9, kept un-padded in HBM
    Hp = _round_up(hidden, 128)
    Dp = _round_up(D, 128)

    # Lane-dense bf16 MXU operands (weights padded once; patches left at real K).
    w1 = jnp.pad(params["w_conv"].reshape(hidden, K).T,
                 ((0, 0), (0, Hp - hidden))).astype(jnp.bfloat16)          # (K, Hp)
    b1 = jnp.pad(params["b_conv"], (0, Hp - hidden)).reshape(1, Hp).astype(jnp.float32)
    w2 = jnp.pad(params["w_fpn"],
                 ((0, Hp - hidden), (0, Dp - D))).astype(jnp.bfloat16)     # (Hp, Dp)
    b2 = jnp.pad(params["b_fpn"], (0, Dp - D)).reshape(1, Dp).astype(jnp.float32)

    feat = pallas_backbone_fpn(patches, w1, b1, w2, b2)  # ((B*ni+B)*Ntok, Dp) bf16

    n_train_rows = B * num_images * Ntok
    train_feat = feat[:n_train_rows].reshape(B, num_images * Ntok, Dp)
    test_feat = feat[n_train_rows:].reshape(B, Ntok, Dp)

    # Template tokens: pad to lane-dense multiple of 128, masked via additive bias.
    Ns = num_images * Ntok
    Nsp = _round_up(Ns, 128)
    if Nsp != Ns:
        train_feat = jnp.pad(train_feat, ((0, 0), (0, Nsp - Ns), (0, 0)))
    mask_bias = jnp.where(jnp.arange(Nsp) < Ns, 0.0, -1e30)
    mask_bias = mask_bias.reshape(1, Nsp).astype(jnp.float32)

    # Search tokens: pad to a multiple of 128 so the head tiles queries (TQ=128/256).
    Nt = Ntok
    Ntp = _round_up(Nt, 128)
    if Ntp != Nt:
        test_feat = jnp.pad(test_feat, ((0, 0), (0, Ntp - Nt), (0, 0)))

    # Fuse cls + reg projections into one lane-dense (Dp, 128) matmul; split outside.
    w_head = jnp.concatenate([params["w_cls"], params["w_reg"]], axis=1)   # (D, 6)
    n_out = w_head.shape[1]
    Np = _round_up(n_out, 128)
    w_head = jnp.pad(w_head, ((0, Dp - D), (0, Np - n_out))).astype(jnp.bfloat16)
    b_head = jnp.pad(jnp.concatenate([params["b_cls"], params["b_reg"]]),
                     (0, Np - n_out)).reshape(1, Np).astype(jnp.float32)

    # TODO(synk): the full SiamTPN TPN head (output projection / LayerNorm / FFN)
    # is not modeled; only cross-attention + fused cls/reg projection is implemented.
    out = pallas_head(test_feat, train_feat, mask_bias, w_head, b_head, d_real=D)
    out = out[:, :Nt]                                   # drop padded query rows
    return {"pred_logits": out[..., :2], "pred_boxes": out[..., 2:6]}


# ----------------------------------------------------------------------------
# Driver
# ----------------------------------------------------------------------------
if __name__ == "__main__":
    key = jax.random.PRNGKey(0)
    num_images, B, C, H, W = 1, 2, 4, 16, 16
    hidden, D = 32, 32

    ks = jax.random.split(key, 8)
    train_imgs = jax.random.normal(ks[0], (num_images, B, C, H, W), jnp.float32)
    test_img = jax.random.normal(ks[1], (B, C, H, W), jnp.float32)

    params = {
        # backbone conv: PyTorch layout (Cout, Cin, kh, kw)
        "w_conv": 0.1 * jax.random.normal(ks[2], (hidden, C, 3, 3), jnp.float32),
        "b_conv": jnp.zeros((hidden,), jnp.float32),
        # FPN 1x1 conv stored matmul-ready as (hidden, D)
        "w_fpn": 0.1 * jax.random.normal(ks[3], (hidden, D), jnp.float32),
        "b_fpn": jnp.zeros((D,), jnp.float32),
        # head linear layers
        "w_cls": 0.1 * jax.random.normal(ks[4], (D, 2), jnp.float32),
        "b_cls": jnp.zeros((2,), jnp.float32),
        "w_reg": 0.1 * jax.random.normal(ks[5], (D, 4), jnp.float32),
        "b_reg": jnp.zeros((4,), jnp.float32),
    }

    fwd = jax.jit(siamtpn_forward)
    out = fwd(train_imgs, test_img, params)
    jax.block_until_ready(out)
    assert out["pred_logits"].shape == (B, 64, 2)
    assert out["pred_boxes"].shape == (B, 64, 4)
    print("KERNEL_OK")
</pallas_src>

<mosaic_0001>
module attributes {stable_mosaic.version = 11 : i64} {
  func.func @_fused_backbone_fpn_kernel(%arg0: i32, %arg1: memref<128x36xbf16, #tpu.memory_space<vmem>>, %arg2: memref<36x128xbf16, #tpu.memory_space<vmem>>, %arg3: memref<1x128xf32, #tpu.memory_space<vmem>>, %arg4: memref<128x128xbf16, #tpu.memory_space<vmem>>, %arg5: memref<1x128xf32, #tpu.memory_space<vmem>>, %arg6: memref<128x128xbf16, #tpu.memory_space<vmem>>) attributes {dimension_semantics = [#tpu.dimension_semantics<parallel>], iteration_bounds = array<i64: 2>, scalar_prefetch = 0 : i64, scratch_operands = 0 : i64, tpu.core_type = #tpu.core_type<tc>, window_params = [{transform_indices = @transform_0, window_bounds = array<i64: 128, 36>}, {pipeline_mode = #tpu.pipeline_mode<synchronous>, transform_indices = @transform_1, window_bounds = array<i64: 36, 128>}, {pipeline_mode = #tpu.pipeline_mode<synchronous>, transform_indices = @transform_2, window_bounds = array<i64: 1, 128>}, {pipeline_mode = #tpu.pipeline_mode<synchronous>, transform_indices = @transform_3, window_bounds = array<i64: 128, 128>}, {pipeline_mode = #tpu.pipeline_mode<synchronous>, transform_indices = @transform_4, window_bounds = array<i64: 1, 128>}, {transform_indices = @transform_5, window_bounds = array<i64: 128, 128>}]} {
    %c0 = arith.constant 0 : index
    %c0_0 = arith.constant 0 : index
    %0 = vector.load %arg1[%c0, %c0_0] : memref<128x36xbf16, #tpu.memory_space<vmem>>, vector<128x36xbf16>
    %c0_1 = arith.constant 0 : index
    %c0_2 = arith.constant 0 : index
    %1 = vector.load %arg2[%c0_1, %c0_2] : memref<36x128xbf16, #tpu.memory_space<vmem>>, vector<36x128xbf16>
    %cst = arith.constant dense<0.000000e+00> : vector<128x128xf32>
    %2 = tpu.matmul %0, %1, %cst {dimension_numbers = #tpu.dot_dimension_numbers<[1], [0], [0], [1], [0, 0, 1, 1], [], []>} : vector<128x36xbf16>, vector<36x128xbf16>, vector<128x128xf32> -> vector<128x128xf32>
    %c0_3 = arith.constant 0 : index
    %c0_4 = arith.constant 0 : index
    %3 = vector.load %arg3[%c0_3, %c0_4] : memref<1x128xf32, #tpu.memory_space<vmem>>, vector<1x128xf32>
    %4 = vector.broadcast %3 : vector<1x128xf32> to vector<128x128xf32>
    %5 = arith.addf %2, %4 : vector<128x128xf32>
    %cst_5 = arith.constant 0.000000e+00 : f32
    %6 = vector.broadcast %cst_5 : f32 to vector<128x128xf32>
    %7 = arith.maximumf %5, %6 : vector<128x128xf32>
    %8 = arith.truncf %7 : vector<128x128xf32> to vector<128x128xbf16>
    %c0_6 = arith.constant 0 : index
    %c0_7 = arith.constant 0 : index
    %9 = vector.load %arg4[%c0_6, %c0_7] : memref<128x128xbf16, #tpu.memory_space<vmem>>, vector<128x128xbf16>
    %cst_8 = arith.constant dense<0.000000e+00> : vector<128x128xf32>
    %10 = tpu.matmul %8, %9, %cst_8 {dimension_numbers = #tpu.dot_dimension_numbers<[1], [0], [0], [1], [0, 0, 1, 1], [], []>} : vector<128x128xbf16>, vector<128x128xbf16>, vector<128x128xf32> -> vector<128x128xf32>
    %c0_9 = arith.constant 0 : index
    %c0_10 = arith.constant 0 : index
    %11 = vector.load %arg5[%c0_9, %c0_10] : memref<1x128xf32, #tpu.memory_space<vmem>>, vector<1x128xf32>
    %12 = vector.broadcast %11 : vector<1x128xf32> to vector<128x128xf32>
    %13 = arith.addf %10, %12 : vector<128x128xf32>
    %cst_11 = arith.constant 0.000000e+00 : f32
    %14 = vector.broadcast %cst_11 : f32 to vector<128x128xf32>
    %15 = arith.maximumf %13, %14 : vector<128x128xf32>
    %16 = arith.truncf %15 : vector<128x128xf32> to vector<128x128xbf16>
    %c0_12 = arith.constant 0 : index
    %c0_13 = arith.constant 0 : index
    %17 = vector.load %arg6[%c0_12, %c0_13] : memref<128x128xbf16, #tpu.memory_space<vmem>>, vector<128x128xbf16>
    tpu.vector_store %arg6[%c0_12, %c0_13], %16 {strides = array<i32>} : memref<128x128xbf16, #tpu.memory_space<vmem>>, vector<128x128xbf16>,
    return
  }
  func.func @transform_0(%arg0: i32) -> (i32, i32) {
    %c0_i32 = arith.constant 0 : i32
    %c0_i32_0 = arith.constant 0 : i32
    return %arg0, %c0_i32 : i32, i32
  }
  func.func @transform_1(%arg0: i32) -> (i32, i32) {
    %c0_i32 = arith.constant 0 : i32
    %c0_i32_0 = arith.constant 0 : i32
    %c0_i32_1 = arith.constant 0 : i32
    return %c0_i32, %c0_i32_0 : i32, i32
  }
  func.func @transform_2(%arg0: i32) -> (i32, i32) {
    %c0_i32 = arith.constant 0 : i32
    %c0_i32_0 = arith.constant 0 : i32
    %c0_i32_1 = arith.constant 0 : i32
    return %c0_i32, %c0_i32_0 : i32, i32
  }
  func.func @transform_3(%arg0: i32) -> (i32, i32) {
    %c0_i32 = arith.constant 0 : i32
    %c0_i32_0 = arith.constant 0 : i32
    %c0_i32_1 = arith.constant 0 : i32
    return %c0_i32, %c0_i32_0 : i32, i32
  }
  func.func @transform_4(%arg0: i32) -> (i32, i32) {
    %c0_i32 = arith.constant 0 : i32
    %c0_i32_0 = arith.constant 0 : i32
    %c0_i32_1 = arith.constant 0 : i32
    return %c0_i32, %c0_i32_0 : i32, i32
  }
  func.func @transform_5(%arg0: i32) -> (i32, i32) {
    %c0_i32 = arith.constant 0 : i32
    %c0_i32_0 = arith.constant 0 : i32
    return %arg0, %c0_i32 : i32, i32
  }
}

module attributes {stable_mosaic.version = 11 : i64} {
  func.func @kernel(%arg0: i32, %arg1: i32, %arg2: memref<1x128x128xbf16, #tpu.memory_space<vmem>>, %arg3: memref<1x128x128xbf16, #tpu.memory_space<vmem>>, %arg4: memref<1x128xf32, #tpu.memory_space<vmem>>, %arg5: memref<128x128xbf16, #tpu.memory_space<vmem>>, %arg6: memref<1x128xf32, #tpu.memory_space<vmem>>, %arg7: memref<1x128x128xf32, #tpu.memory_space<vmem>>) attributes {dimension_semantics = [#tpu.dimension_semantics<parallel>, #tpu.dimension_semantics<parallel>], iteration_bounds = array<i64: 2, 1>, scalar_prefetch = 0 : i64, scratch_operands = 0 : i64, tpu.core_type = #tpu.core_type<tc>, window_params = [{transform_indices = @transform_0, window_bounds = array<i64: 1, 128, 128>}, {transform_indices = @transform_1, window_bounds = array<i64: 1, 128, 128>}, {pipeline_mode = #tpu.pipeline_mode<synchronous>, transform_indices = @transform_2, window_bounds = array<i64: 1, 128>}, {pipeline_mode = #tpu.pipeline_mode<synchronous>, transform_indices = @transform_3, window_bounds = array<i64: 128, 128>}, {pipeline_mode = #tpu.pipeline_mode<synchronous>, transform_indices = @transform_4, window_bounds = array<i64: 1, 128>}, {transform_indices = @transform_5, window_bounds = array<i64: 1, 128, 128>}]} {
    %c0 = arith.constant 0 : index
    %c0_0 = arith.constant 0 : index
    %c0_1 = arith.constant 0 : index
    %0 = vector.load %arg2[%c0, %c0_0, %c0_1] : memref<1x128x128xbf16, #tpu.memory_space<vmem>>, vector<1x128x128xbf16>
    %1 = vector.shape_cast %0 : vector<1x128x128xbf16> to vector<128x128xbf16>
    %c0_2 = arith.constant 0 : index
    %c0_3 = arith.constant 0 : index
    %c0_4 = arith.constant 0 : index
    %2 = vector.load %arg3[%c0_2, %c0_3, %c0_4] : memref<1x128x128xbf16, #tpu.memory_space<vmem>>, vector<1x128x128xbf16>
    %3 = vector.shape_cast %2 : vector<1x128x128xbf16> to vector<128x128xbf16>
    %cst = arith.constant dense<0.000000e+00> : vector<128x128xf32>
    %4 = tpu.matmul %1, %3, %cst {dimension_numbers = #tpu.dot_dimension_numbers<[1], [1], [0], [0], [0, 0, 1, 0], [], []>} : vector<128x128xbf16>, vector<128x128xbf16>, vector<128x128xf32> -> vector<128x128xf32>
    %cst_5 = arith.constant 0.176776692 : f32
    %5 = vector.broadcast %cst_5 : f32 to vector<128x128xf32>
    %6 = arith.mulf %4, %5 : vector<128x128xf32>
    %c0_6 = arith.constant 0 : index
    %c0_7 = arith.constant 0 : index
    %7 = vector.load %arg4[%c0_6, %c0_7] : memref<1x128xf32, #tpu.memory_space<vmem>>, vector<1x128xf32>
    %8 = vector.broadcast %7 : vector<1x128xf32> to vector<128x128xf32>
    %9 = arith.addf %6, %8 : vector<128x128xf32>
    %cst_8 = arith.constant dense<0xFF800000> : vector<128xf32>
    %10 = vector.multi_reduction <maximumf>, %9, %cst_8 [1] : vector<128x128xf32> to vector<128xf32>
    %11 = vector.shape_cast %10 : vector<128xf32> to vector<128x1xf32>
    %12 = vector.broadcast %11 : vector<128x1xf32> to vector<128x128xf32>
    %13 = arith.subf %9, %12 : vector<128x128xf32>
    %14 = math.exp %13 : vector<128x128xf32>
    %cst_9 = arith.constant dense<0.000000e+00> : vector<128xf32>
    %15 = vector.multi_reduction <add>, %14, %cst_9 [1] : vector<128x128xf32> to vector<128xf32>
    %16 = vector.shape_cast %15 : vector<128xf32> to vector<128x1xf32>
    %17 = tpu.reciprocal %16 {approx = true} : vector<128x1xf32> -> vector<128x1xf32>
    %18 = vector.broadcast %17 : vector<128x1xf32> to vector<128x128xf32>
    %19 = arith.mulf %14, %18 : vector<128x128xf32>
    %20 = arith.truncf %19 : vector<128x128xf32> to vector<128x128xbf16>
    %cst_10 = arith.constant dense<0.000000e+00> : vector<128x128xf32>
    %21 = tpu.matmul %20, %3, %cst_10 {dimension_numbers = #tpu.dot_dimension_numbers<[1], [0], [0], [1], [0, 0, 1, 1], [], []>} : vector<128x128xbf16>, vector<128x128xbf16>, vector<128x128xf32> -> vector<128x128xf32>
    %22 = arith.extf %1 : vector<128x128xbf16> to vector<128x128xf32>
    %23 = arith.addf %22, %21 : vector<128x128xf32>
    %24 = arith.truncf %23 : vector<128x128xf32> to vector<128x128xbf16>
    %c0_11 = arith.constant 0 : index
    %c0_12 = arith.constant 0 : index
    %25 = vector.load %arg5[%c0_11, %c0_12] : memref<128x128xbf16, #tpu.memory_space<vmem>>, vector<128x128xbf16>
    %cst_13 = arith.constant dense<0.000000e+00> : vector<128x128xf32>
    %26 = tpu.matmul %24, %25, %cst_13 {dimension_numbers = #tpu.dot_dimension_numbers<[1], [0], [0], [1], [0, 0, 1, 1], [], []>} : vector<128x128xbf16>, vector<128x128xbf16>, vector<128x128xf32> -> vector<128x128xf32>
    %c0_14 = arith.constant 0 : index
    %c0_15 = arith.constant 0 : index
    %27 = vector.load %arg6[%c0_14, %c0_15] : memref<1x128xf32, #tpu.memory_space<vmem>>, vector<1x128xf32>
    %28 = vector.broadcast %27 : vector<1x128xf32> to vector<128x128xf32>
    %29 = arith.addf %26, %28 : vector<128x128xf32>
    %c0_16 = arith.constant 0 : index
    %c0_17 = arith.constant 0 : index
    %c0_18 = arith.constant 0 : index
    %30 = vector.load %arg7[%c0_16, %c0_17, %c0_18] : memref<1x128x128xf32, #tpu.memory_space<vmem>>, vector<1x128x128xf32>
    %31 = vector.shape_cast %30 : vector<1x128x128xf32> to vector<128x128xf32>
    %32 = vector.shape_cast %29 : vector<128x128xf32> to vector<1x128x128xf32>
    tpu.vector_store %arg7[%c0_16, %c0_17, %c0_18], %32 {strides = array<i32>} : memref<1x128x128xf32, #tpu.memory_space<vmem>>, vector<1x128x128xf32>,
    return
  }
  func.func @transform_0(%arg0: i32, %arg1: i32) -> (i32, i32, i32) {
    %c0_i32 = arith.constant 0 : i32
    %c0_i32_0 = arith.constant 0 : i32
    return %arg0, %arg1, %c0_i32 : i32, i32, i32
  }
  func.func @transform_1(%arg0: i32, %arg1: i32) -> (i32, i32, i32) {
    %c0_i32 = arith.constant 0 : i32
    %c0_i32_0 = arith.constant 0 : i32
    %c0_i32_1 = arith.constant 0 : i32
    return %arg0, %c0_i32, %c0_i32_0 : i32, i32, i32
  }
  func.func @transform_2(%arg0: i32, %arg1: i32) -> (i32, i32) {
    %c0_i32 = arith.constant 0 : i32
    %c0_i32_0 = arith.constant 0 : i32
    %c0_i32_1 = arith.constant 0 : i32
    return %c0_i32, %c0_i32_0 : i32, i32
  }
  func.func @transform_3(%arg0: i32, %arg1: i32) -> (i32, i32) {
    %c0_i32 = arith.constant 0 : i32
    %c0_i32_0 = arith.constant 0 : i32
    %c0_i32_1 = arith.constant 0 : i32
    return %c0_i32, %c0_i32_0 : i32, i32
  }
  func.func @transform_4(%arg0: i32, %arg1: i32) -> (i32, i32) {
    %c0_i32 = arith.constant 0 : i32
    %c0_i32_0 = arith.constant 0 : i32
    %c0_i32_1 = arith.constant 0 : i32
    return %c0_i32, %c0_i32_0 : i32, i32
  }
  func.func @transform_5(%arg0: i32, %arg1: i32) -> (i32, i32, i32) {
    %c0_i32 = arith.constant 0 : i32
    %c0_i32_0 = arith.constant 0 : i32
    return %arg0, %arg1, %c0_i32 : i32, i32, i32
  }
}

</mosaic_0001>

<bundles_post_ra>
// kernel: siamtpn_forward.2
= control target key start
LH: loop header
LB: loop body
LE: loop exit
PB: predicated region body
PF: predicated region fallthrough
CT: control target
= control target key end

     0   :  { %s1064_s18 = smov 0   ;;  %s1155_s0 = inlined_call_operand.vmem [shape: bf16[256,36], index: 0, kind: input, shape index: {}]   ;;  %s1156_s1 = inlined_call_operand.vmem [shape: bf16[36,128], index: 1, kind: input, shape index: {}]   ;;  %s1157_s2 = inlined_call_operand.vmem [shape: f32[1,128], index: 2, kind: input, shape index: {}]   ;;  %s1158_s3 = inlined_call_operand.vmem [shape: bf16[128,128], index: 3, kind: input, shape index: {}]   ;;  %s1159_s4 = inlined_call_operand.vmem [shape: f32[1,128], index: 4, kind: input, shape index: {}]   ;;  %s1160_s5 = inlined_call_operand.vmem [shape: bf16[256,128], index: 5, kind: output, shape index: {}]  }
   0x1 LB: > { %s782_s19 = sadd.s32 4294967295, %s1032_s18   ;;  %p786_p0 = scmp.ge.s32.totalorder %s1032_s18, 1  ;;  %s1032_s18 = sphi %s1064_s18, %s15_s18  }
   0x2   : > { %p188_p1 = scmp.lt.s32.totalorder %s1032_s18, 3 }
   0x4   : > { %p189_p2 = pnand %p786_p0, %p188_p1 }
   0x5   : > { %v1007_v0 = vld [vmem:[%s1156_s1] sm:$0xff] (!%p189_p2)   ;;  %v1008_v1 = vld [vmem:[%s1156_s1 + $0x8] sm:$0xff] (!%p189_p2)   ;;  %s787_s24 = sshll.u32 (!%p189_p2), %s782_s19, 4  ;;  %v1009_v2 = vld [vmem:[%s1156_s1 + $0x10] ss:$0 sps:$4 sm:$0x33] (!%p189_p2)  }
   0x6   : > { %192 = sbr.rel (%p189_p2) target bundleno = 486 (0x1e6), region = 40  ;;  %928 = vmatprep.subr.bf16.mxu0 (!%p189_p2), %v1007_v0  ;;  %p217_p3 = scmp.lt.s32.totalorder (!%p189_p2), %s787_s24, 31  ;;  %v1018_v3 = vld [vmem:[%s1158_s3] sm:$0xff] (!%p189_p2)   ;;  %vm337_vm0 = vcmask (!%p189_p2), 1041408   ;;  %v1019_v4 = vld [vmem:[%s1158_s3 + $0x8] sm:$0xff] (!%p189_p2)   ;;  %vm312_vm1 = vcmask (!%p189_p2), 293888  }
   0x7   : > { %929 = vmatpush3.bf16.msra.mxu0 (!%p189_p2), %v1007_v0  ;;  %982 = vmatprep.subr.bf16.mxu1 (!%p189_p2), %v1018_v3  ;;  %v339_v5 = vsel (!%p189_p2), %vm337_vm0, %v1009_v2, 0  ;;  %v1020_v7 = vld [vmem:[%s1158_s3 + $0x10] sm:$0xff] (!%p189_p2)   ;;  %v1021_v10 = vld [vmem:[%s1158_s3 + $0x18] sm:$0xff] (!%p189_p2)   ;;  %v1022_v11 = vld [vmem:[%s1158_s3 + $0x20] sm:$0xff] (!%p189_p2)  }
   0x8   : > { %930 = vmatprep.subr.bf16.mxu0 (!%p189_p2), %v1008_v1  ;;  %990 = vmatpush3.bf16.msra.mxu1 (!%p189_p2), %v1018_v3  ;;  %v1023_v14 = vld [vmem:[%s1158_s3 + $0x28] sm:$0xff] (!%p189_p2)   ;;  %v1024_v18 = vld [vmem:[%s1158_s3 + $0x30] sm:$0xff] (!%p189_p2)   ;;  %v1025_v19 = vld [vmem:[%s1158_s3 + $0x38] sm:$0xff] (!%p189_p2)  }
   0x9   : > { %983 = vmatprep.subr.bf16.mxu1 (!%p189_p2), %v1019_v4  ;;  %v791_v20 = vld [vmem:[%s1157_s2] ss:$0 sm:$0xff] (!%p189_p2) }
   0xb   : > { %931 = vmatpush3.bf16.msra.mxu0 (!%p189_p2), %v1008_v1 }
   0xc   : > { %998 = vmatprep.subr.msk.bf16.mxu0 (!%p189_p2), %vm337_vm0, %v1009_v2  ;;  %991 = vmatpush3.bf16.msra.mxu1 (!%p189_p2), %v1019_v4 }
   0xd   : > { %s1162_s24 = smov (!%p217_p3, %s787_s24), 31  ;;  %984 = vmatprep.subr.bf16.mxu1 %v1020_v7 }
   0xe   : > { %s788_s6 = sshll.u32 %s1162_s24, 2 }
   0xf   : > { %s1095_s9 = scalar_lea.vmem %s1155_s0, %s788_s6  ;;  %933 = vmatpush3.bf16.msra.mxu0 %v339_v5  ;;  %s1142_s30 = scalar_lea.vmem %s1160_s5, %s788_s6 }
  0x10   : > { %v1010_v6 = vld [vmem:[%s1095_s9] sm:$0xff]   ;;  %v1011_v8 = vld [vmem:[%s1095_s9 + $0x8] sm:$0xff]   ;;  %v1012_v9 = vld [vmem:[%s1095_s9 + $0x10] sm:$0xff]   ;;  %950 = vmatprep.subr.bf16.mxu0 %v1018_v3  ;;  %992 = vmatpush3.bf16.msra.mxu1 %v1020_v7 }
  0x11   : > { %934 = vmatprep.mubr.msk.bf16.mxu0 %vm312_vm1, %v1010_v6  ;;  %985 = vmatprep.subr.bf16.mxu1 %v1021_v10  ;;  %v1013_v12 = vld [vmem:[%s1095_s9 + $0x18] sm:$0xff]   ;;  %v1014_v13 = vld [vmem:[%s1095_s9 + $0x20] sm:$0xff]   ;;  %v1015_v15 = vld [vmem:[%s1095_s9 + $0x28] sm:$0xff]  }
  0x12   : > { %935 = vmatmul.mubr.msk.bf16.vlgmr.msra.gmra.mrb[0].mxu0 %vm312_vm1, %v1011_v8  ;;  %v1016_v16 = vld [vmem:[%s1095_s9 + $0x30] sm:$0xff]   ;;  %v1017_v17 = vld [vmem:[%s1095_s9 + $0x38] sm:$0xff]  }
  0x13   : > { %938 = vmatprep.mubr.msk.bf16.mxu0 %vm312_vm1, %v1012_v9  ;;  %951 = vmatpush3.bf16.msra.mxu0 %v1018_v3 }
  0x14   : > { %952 = vmatprep.subr.bf16.mxu0 %v1019_v4  ;;  %993 = vmatpush3.bf16.msra.mxu1 %v1021_v10 }
  0x15   : > { %986 = vmatprep.subr.bf16.mxu1 %v1022_v11 }
  0x17   : > { %953 = vmatpush3.bf16.msra.mxu0 %v1019_v4 }
  0x18   : > { %954 = vmatprep.subr.bf16.mxu0 %v1020_v7  ;;  %994 = vmatpush3.bf16.msra.mxu1 %v1022_v11 }
  0x19   : > { %987 = vmatprep.subr.bf16.mxu1 %v1023_v14 }
  0x1a   : > { %939 = vmatmul.mubr.msk.bf16.gmra.mrb[4].mxu0 %vm312_vm1, %v1013_v12 }
  0x1b   : > { %942 = vmatprep.mubr.msk.bf16.mxu0 %vm312_vm1, %v1014_v13  ;;  %955 = vmatpush3.bf16.msra.mxu0 %v1020_v7  ;;  %v811_v13 = vld [vmem:[%s1159_s4] ss:$0 sm:$0xff] }
  0x1c   : > { %956 = vmatprep.subr.bf16.mxu0 %v1021_v10  ;;  %995 = vmatpush3.bf16.msra.mxu1 %v1023_v14 }
  0x1d   : > { %988 = vmatprep.subr.bf16.mxu1 %v1024_v18 }
  0x1f   : > { %957 = vmatpush3.bf16.msra.mxu0 %v1021_v10 }
  0x20   : > { %958 = vmatprep.subr.bf16.mxu0 %v1022_v11  ;;  %996 = vmatpush3.bf16.msra.mxu1 %v1024_v18 }
  0x21   : > { %989 = vmatprep.subr.bf16.mxu1 %v1025_v19 }
  0x22   : > { %943 = vmatmul.mubr.msk.bf16.gmra.mrb[8].mxu0 %vm312_vm1, %v1015_v15 }
  0x23   : > { %946 = vmatprep.mubr.msk.bf16.mxu0 %vm312_vm1, %v1016_v16  ;;  %959 = vmatpush3.bf16.msra.mxu0 %v1022_v11 }
  0x24   : > { %960 = vmatprep.subr.bf16.mxu0 %v1023_v14  ;;  %997 = vmatpush3.bf16.msra.mxu1 %v1025_v19 }
  0x27   : > { %961 = vmatpush3.bf16.msra.mxu0 %v1023_v14 }
  0x28   : > { %962 = vmatprep.subr.bf16.mxu0 %v1024_v18 }
  0x2a   : > { %947 = vmatmul.mubr.msk.bf16.gmra.mrb[12].mxu0 %vm312_vm1, %v1017_v17 }
  0x2b   : > { %963 = vmatpush3.bf16.msra.mxu0 %v1024_v18 }
  0x2c   : > { %964 = vmatprep.subr.bf16.mxu0 %v1025_v19 }
  0x2f   : > { %965 = vmatpush3.bf16.msra.mxu0 %v1025_v19 }
  0xe5   : > { %v936_v21 = vpop.f32.mrb[0].mxu0 }
  0xe6   : > { %v384_v22 = vadd.f32 %v936_v21, %v791_v20  ;;  %v375_v23 = vpop.f32.mrb[1].mxu0 }
  0xe7   : > { %v376_v24 = vadd.f32 %v791_v20, %v375_v23  ;;  %v937_v25 = vpop.f32.mrb[2].mxu0 }
  0xe8   : > { %v387_v26 = vadd.f32 %v937_v25, %v791_v20  ;;  %v378_v27 = vpop.f32.mrb[3].mxu0  ;;  %v440_v29 = vmax.f32 %v384_v22, 0.0 }
  0xe9   : > { %v379_v28 = vadd.f32 %v791_v20, %v378_v27  ;;  %v438_v31 = vmax.f32 %v376_v24, 0.0 }
  0xea   : > { %v441_v30 = vmax.f32 %v387_v26, 0.0 }
  0xeb   : > { %v439_v32 = vmax.f32 %v379_v28, 0.0 }
  0xec   : > { %v455_v33 = vpack.c.bf16 %v441_v30, %v440_v29 }
  0xed   : > { %v454_v34 = vpack.c.bf16 %v439_v32, %v438_v31  ;;  %v940_v35 = vpop.f32.mrb[4].mxu0 }
  0xee   : > { %v400_v36 = vadd.f32 %v940_v35, %v791_v20  ;;  %v391_v37 = vpop.f32.mrb[5].mxu0 }
  0xef   : > { %v392_v38 = vadd.f32 %v791_v20, %v391_v37  ;;  %v941_v39 = vpop.f32.mrb[6].mxu0  ;;  %966 = vmatprep.mubr.bf16.mxu0 %v454_v34 }
  0xf0   : > { %v403_v40 = vadd.f32 %v941_v39, %v791_v20  ;;  %v394_v41 = vpop.f32.mrb[7].mxu0  ;;  %967 = vmatmul.mubr.bf16.vlgmr.msra.gmra.mrb[16].mxu0 %v455_v33  ;;  %v444_v43 = vmax.f32 %v400_v36, 0.0 }
  0xf1   : > { %v395_v42 = vadd.f32 %v791_v20, %v394_v41  ;;  %v442_v45 = vmax.f32 %v392_v38, 0.0 }
  0xf2   : > { %v445_v44 = vmax.f32 %v403_v40, 0.0 }
  0xf3   : > { %v443_v46 = vmax.f32 %v395_v42, 0.0 }
  0xf4   : > { %v457_v47 = vpack.c.bf16 %v445_v44, %v444_v43 }
  0xf5   : > { %v944_v48 = vpop.f32.mrb[8].mxu0  ;;  %v456_v49 = vpack.c.bf16 %v443_v46, %v442_v45 }
  0xf6   : > { %v416_v50 = vadd.f32 %v944_v48, %v791_v20  ;;  %v407_v51 = vpop.f32.mrb[9].mxu0 }
  0xf7   : > { %v408_v52 = vadd.f32 %v791_v20, %v407_v51  ;;  %v945_v53 = vpop.f32.mrb[10].mxu0  ;;  %970 = vmatprep.mubr.bf16.mxu1 %v456_v49 }
  0xf8   : > { %v419_v54 = vadd.f32 %v945_v53, %v791_v20  ;;  %v410_v55 = vpop.f32.mrb[11].mxu0  ;;  %971 = vmatmul.mubr.bf16.vlgmr.msra.gmra.mrb[0].mxu1 %v457_v47  ;;  %v448_v57 = vmax.f32 %v416_v50, 0.0 }
  0xf9   : > { %v411_v56 = vadd.f32 %v791_v20, %v410_v55  ;;  %v446_v59 = vmax.f32 %v408_v52, 0.0 }
  0xfa   : > { %v449_v58 = vmax.f32 %v419_v54, 0.0 }
  0xfb   : > { %v447_v60 = vmax.f32 %v411_v56, 0.0 }
  0xfc   : > { %v459_v61 = vpack.c.bf16 %v449_v58, %v448_v57 }
  0xfd   : > { %v458_v62 = vpack.c.bf16 %v447_v60, %v446_v59  ;;  %v948_v63 = vpop.f32.mrb[12].mxu0 }
  0xfe   : > { %v432_v0 = vadd.f32 %v948_v63, %v791_v20  ;;  %v423_v1 = vpop.f32.mrb[13].mxu0 }
  0xff   : > { %v424_v2 = vadd.f32 %v791_v20, %v423_v1  ;;  %v949_v3 = vpop.f32.mrb[14].mxu0  ;;  %974 = vmatprep.mubr.bf16.mxu1 %v458_v62 }
 0x100   : > { %v435_v4 = vadd.f32 %v949_v3, %v791_v20  ;;  %v426_v5 = vpop.f32.mrb[15].mxu0  ;;  %975 = vmatmul.mubr.bf16.gmra.mrb[4].mxu1 %v459_v61  ;;  %v452_v7 = vmax.f32 %v432_v0, 0.0 }
 0x101   : > { %v427_v6 = vadd.f32 %v791_v20, %v426_v5  ;;  %v450_v9 = vmax.f32 %v424_v2, 0.0 }
 0x102   : > { %v453_v8 = vmax.f32 %v435_v4, 0.0 }
 0x103   : > { %v451_v10 = vmax.f32 %v427_v6, 0.0 }
 0x104   : > { %v461_v11 = vpack.c.bf16 %v453_v8, %v452_v7 }
 0x105   : > { %v460_v12 = vpack.c.bf16 %v451_v10, %v450_v9 }
 0x107   : > { %978 = vmatprep.mubr.bf16.mxu1 %v460_v12 }
 0x108   : > { %979 = vmatmul.mubr.bf16.gmra.mrb[8].mxu1 %v461_v11 }
 0x1c3   : > { %v968_v14 = vpop.f32.mrb[16].mxu0 }
 0x1c4   : > { %v576_v15 = vadd.f32 %v968_v14, %v811_v13  ;;  %v567_v16 = vpop.f32.mrb[17].mxu0 }
 0x1c5   : > { %v568_v17 = vadd.f32 %v811_v13, %v567_v16  ;;  %v969_v18 = vpop.f32.mrb[18].mxu0 }
 0x1c6   : > { %v579_v19 = vadd.f32 %v969_v18, %v811_v13  ;;  %v570_v20 = vpop.f32.mrb[19].mxu0  ;;  %v632_v22 = vmax.f32 %v576_v15, 0.0 }
 0x1c7   : > { %v571_v21 = vadd.f32 %v811_v13, %v570_v20  ;;  %v630_v24 = vmax.f32 %v568_v17, 0.0 }
 0x1c8   : > { %v633_v23 = vmax.f32 %v579_v19, 0.0 }
 0x1c9   : > { %v631_v25 = vmax.f32 %v571_v21, 0.0 }
 0x1ca   : > { %v862_v26 = vpack.c.bf16 %v633_v23, %v632_v22 }
 0x1cb   : > { %v857_v27 = vpack.c.bf16 %v631_v25, %v630_v24  ;;  %v972_v28 = vpop.f32.mrb[0].mxu1 }
 0x1cc   : > { %894 = vst [vmem:[%s1142_s30 + $0x8] sm:$0xff] %v862_v26   ;;  %v592_v29 = vadd.f32 %v972_v28, %v811_v13  ;;  %v583_v30 = vpop.f32.mrb[1].mxu1 }
 0x1cd   : > { %858 = vst [vmem:[%s1142_s30] sm:$0xff] %v857_v27   ;;  %v584_v31 = vadd.f32 %v811_v13, %v583_v30  ;;  %v973_v32 = vpop.f32.mrb[2].mxu1 }
 0x1ce   : > { %v595_v33 = vadd.f32 %v973_v32, %v811_v13  ;;  %v586_v34 = vpop.f32.mrb[3].mxu1  ;;  %v636_v36 = vmax.f32 %v592_v29, 0.0 }
 0x1cf   : > { %v587_v35 = vadd.f32 %v811_v13, %v586_v34  ;;  %v634_v38 = vmax.f32 %v584_v31, 0.0 }
 0x1d0   : > { %v637_v37 = vmax.f32 %v595_v33, 0.0 }
 0x1d1   : > { %v635_v39 = vmax.f32 %v587_v35, 0.0 }
 0x1d2   : > { %v872_v40 = vpack.c.bf16 %v637_v37, %v636_v36 }
 0x1d3   : > { %v867_v41 = vpack.c.bf16 %v635_v39, %v634_v38  ;;  %v976_v42 = vpop.f32.mrb[4].mxu1 }
 0x1d4   : > { %896 = vst [vmem:[%s1142_s30 + $0x18] sm:$0xff] %v872_v40   ;;  %v608_v43 = vadd.f32 %v976_v42, %v811_v13  ;;  %v599_v44 = vpop.f32.mrb[5].mxu1 }
 0x1d5   : > { %895 = vst [vmem:[%s1142_s30 + $0x10] sm:$0xff] %v867_v41   ;;  %v600_v45 = vadd.f32 %v811_v13, %v599_v44  ;;  %v977_v46 = vpop.f32.mrb[6].mxu1 }
 0x1d6   : > { %v611_v47 = vadd.f32 %v977_v46, %v811_v13  ;;  %v602_v48 = vpop.f32.mrb[7].mxu1  ;;  %v640_v50 = vmax.f32 %v608_v43, 0.0 }
 0x1d7   : > { %v603_v49 = vadd.f32 %v811_v13, %v602_v48  ;;  %v638_v52 = vmax.f32 %v600_v45, 0.0 }
 0x1d8   : > { %v641_v51 = vmax.f32 %v611_v47, 0.0 }
 0x1d9   : > { %v639_v53 = vmax.f32 %v603_v49, 0.0 }
 0x1da   : > { %v882_v54 = vpack.c.bf16 %v641_v51, %v640_v50 }
 0x1db   : > { %v877_v55 = vpack.c.bf16 %v639_v53, %v638_v52  ;;  %v980_v56 = vpop.f32.mrb[8].mxu1 }
 0x1dc   : > { %898 = vst [vmem:[%s1142_s30 + $0x28] sm:$0xff] %v882_v54   ;;  %v624_v57 = vadd.f32 %v980_v56, %v811_v13  ;;  %v615_v58 = vpop.f32.mrb[9].mxu1 }
 0x1dd   : > { %897 = vst [vmem:[%s1142_s30 + $0x20] sm:$0xff] %v877_v55   ;;  %v616_v59 = vadd.f32 %v811_v13, %v615_v58  ;;  %v981_v60 = vpop.f32.mrb[10].mxu1 }
 0x1de   : > { %v627_v61 = vadd.f32 %v981_v60, %v811_v13  ;;  %v618_v62 = vpop.f32.mrb[11].mxu1  ;;  %v644_v0 = vmax.f32 %v624_v57, 0.0 }
 0x1df   : > { %v619_v63 = vadd.f32 %v811_v13, %v618_v62  ;;  %v642_v2 = vmax.f32 %v616_v59, 0.0 }
 0x1e0   : > { %v645_v1 = vmax.f32 %v627_v61, 0.0 }
 0x1e1   : > { %v643_v3 = vmax.f32 %v619_v63, 0.0 }
 0x1e2   : > { %v892_v4 = vpack.c.bf16 %v645_v1, %v644_v0 }
 0x1e3   : > { %v887_v5 = vpack.c.bf16 %v643_v3, %v642_v2 }
 0x1e4   : > { %900 = vst [vmem:[%s1142_s30 + $0x38] sm:$0xff] %v892_v4  }
 0x1e5   : > { %899 = vst [vmem:[%s1142_s30 + $0x30] sm:$0xff] %v887_v5  }
 0x1e6 PF: > { %s15_s18 = sadd.s32 1, %s1032_s18  }
 0x1e7   : > { %p12_p4 = scmp.ge.s32.totalorder %s15_s18, 4  }
 0x1e9   :  { %14 = sbr.rel (!%p12_p4) target bundleno = 1 (0x1), region = 70 }

// kernel: siamtpn_forward.3
= control target key start
LH: loop header
LB: loop body
LE: loop exit
PB: predicated region body
PF: predicated region fallthrough
CT: control target
= control target key end

     0   :  { %s1481_s18 = smov 0   ;;  %s1483_s19 = smov 0   ;;  %s1737_s0 = inlined_call_operand.vmem [shape: bf16[2,128,128], index: 0, kind: input, shape index: {}]   ;;  %s1738_s1 = inlined_call_operand.vmem [shape: bf16[2,128,128], index: 1, kind: input, shape index: {}]   ;;  %s1739_s2 = inlined_call_operand.vmem [shape: f32[1,128], index: 2, kind: input, shape index: {}]   ;;  %s1740_s3 = inlined_call_operand.vmem [shape: bf16[128,128], index: 3, kind: input, shape index: {}]   ;;  %s1741_s4 = inlined_call_operand.vmem [shape: f32[1,128], index: 4, kind: input, shape index: {}]   ;;  %s1742_s5 = inlined_call_operand.vmem [shape: f32[2,128,128], index: 5, kind: output, shape index: {}]  }
   0x1   :  { %s1485_s20 = smov 0  }
   0x2 LB: > { %s27_s21 = sadd.s32 1, %s1445_s19  ;;  %p1125_p0 = scmp.ge.s32.totalorder %s1449_s20, 1  ;;  %s1449_s20 = sphi %s1485_s20, %s15_s20   ;;  %s1445_s19 = sphi %s1483_s19, %s1744_s19   ;;  %s1441_s18 = sphi %s1481_s18, %s1743_s18  }
   0x3   : > { %p29_p1 = scmp.ge.s32.totalorder %s27_s21, 2  ;;  %p218_p2 = scmp.lt.s32.totalorder %s1449_s20, 3 }
   0x5   : > { %s1746_s21 = smov (%p29_p1, %s27_s21), 0  ;;  %p219_p3 = pnand %p1125_p0, %p218_p2 }
   0x6   : > { %p260_p4 = scmp.lt.s32.totalorder (!%p219_p3), %s1441_s18, 1  ;;  %v1148_v17 = vld [vmem:[%s1739_s2] ss:$0 sm:$0xff] (!%p219_p3) }
   0x7   : > { %222 = sbr.rel (%p219_p3) target bundleno = 1083 (0x43b), region = 40 }
   0xe   : > { %s1748_s18 = smov (!%p260_p4, %s1441_s18), 1 }
   0xf   : > { %s1160_s22 = sshll.u32 %s1748_s18, 6  ;;  %s1162_s26 = sshll.u32 %s1748_s18, 7 }
  0x10   : > { %s1505_s25 = scalar_lea.vmem %s1738_s1, %s1160_s22  ;;  %s1512_s28 = scalar_lea.vmem %s1737_s0, %s1160_s22 }
  0x11   : > { %v1331_v0 = vld [vmem:[%s1505_s25] sm:$0xff]   ;;  %v1332_v1 = vld [vmem:[%s1505_s25 + $0x8] sm:$0xff]   ;;  %v1333_v2 = vld [vmem:[%s1505_s25 + $0x10] sm:$0xff]   ;;  %s1710_s6 = scalar_lea.vmem %s1742_s5, %s1162_s26 }
  0x12   : > { %1211 = vmatprep.subr.bf16.mxu0 %v1331_v0  ;;  %1243 = vmatprep.subr.bf16.mxu1 %v1331_v0  ;;  %v1516_v3 = vld [vmem:[%s1512_s28] sm:$0xff]   ;;  %v1334_v4 = vld [vmem:[%s1505_s25 + $0x18] sm:$0xff]   ;;  %v1336_v6 = vld [vmem:[%s1505_s25 + $0x28] sm:$0xff]  }
  0x13   : > { %1212 = vmatpush3.bf16.xpose.msra.mxu0 %v1331_v0  ;;  %1244 = vmatpush3.bf16.msra.mxu1 %v1331_v0  ;;  %v1335_v5 = vld [vmem:[%s1505_s25 + $0x20] sm:$0xff]   ;;  %v1337_v7 = vld [vmem:[%s1505_s25 + $0x30] sm:$0xff]   ;;  %v1338_v8 = vld [vmem:[%s1505_s25 + $0x38] sm:$0xff]  }
  0x14   : > { %1213 = vmatprep.subr.bf16.mxu0 %v1332_v1  ;;  %1245 = vmatprep.subr.bf16.mxu1 %v1332_v1  ;;  %v1525_v9 = vld [vmem:[%s1512_s28 + $0x8] sm:$0xff]   ;;  %v1528_v10 = vld [vmem:[%s1512_s28 + $0x10] sm:$0xff]   ;;  %v1533_v11 = vld [vmem:[%s1512_s28 + $0x18] sm:$0xff]  }
  0x15   : > { %1227 = vmatprep.mubr.bf16.mxu0 %v1516_v3  ;;  %v1536_v12 = vld [vmem:[%s1512_s28 + $0x20] sm:$0xff]   ;;  %v1541_v13 = vld [vmem:[%s1512_s28 + $0x28] sm:$0xff]   ;;  %v1544_v14 = vld [vmem:[%s1512_s28 + $0x30] sm:$0xff]  }
  0x16   : > { %v1549_v15 = vld [vmem:[%s1512_s28 + $0x38] sm:$0xff]  }
  0x17   : > { %1246 = vmatpush3.bf16.msra.mxu1 %v1332_v1 }
  0x18   : > { %1247 = vmatprep.subr.bf16.mxu1 %v1333_v2 }
  0x1b   : > { %1214 = vmatpush3.bf16.xpose.msra.mxu0 %v1332_v1  ;;  %1248 = vmatpush3.bf16.msra.mxu1 %v1333_v2 }
  0x1c   : > { %1215 = vmatprep.subr.bf16.mxu0 %v1333_v2  ;;  %1249 = vmatprep.subr.bf16.mxu1 %v1334_v4 }
  0x1f   : > { %1250 = vmatpush3.bf16.msra.mxu1 %v1334_v4 }
  0x20   : > { %1251 = vmatprep.subr.bf16.mxu1 %v1335_v5 }
  0x23   : > { %1216 = vmatpush3.bf16.xpose.msra.mxu0 %v1333_v2  ;;  %1252 = vmatpush3.bf16.msra.mxu1 %v1335_v5 }
  0x24   : > { %1217 = vmatprep.subr.bf16.mxu0 %v1334_v4  ;;  %1253 = vmatprep.subr.bf16.mxu1 %v1336_v6 }
  0x27   : > { %1254 = vmatpush3.bf16.msra.mxu1 %v1336_v6 }
  0x28   : > { %1255 = vmatprep.subr.bf16.mxu1 %v1337_v7 }
  0x2b   : > { %1218 = vmatpush3.bf16.xpose.msra.mxu0 %v1334_v4  ;;  %1256 = vmatpush3.bf16.msra.mxu1 %v1337_v7 }
  0x2c   : > { %1219 = vmatprep.subr.bf16.mxu0 %v1335_v5  ;;  %1257 = vmatprep.subr.bf16.mxu1 %v1338_v8 }
  0x2f   : > { %1258 = vmatpush3.bf16.msra.mxu1 %v1338_v8 }
  0x33   : > { %1220 = vmatpush3.bf16.xpose.msra.mxu0 %v1335_v5 }
  0x34   : > { %1221 = vmatprep.subr.bf16.mxu0 %v1336_v6 }
  0x3b   : > { %1222 = vmatpush3.bf16.xpose.msra.mxu0 %v1336_v6 }
  0x3c   : > { %1223 = vmatprep.subr.bf16.mxu0 %v1337_v7 }
  0x43   : > { %1224 = vmatpush3.bf16.xpose.msra.mxu0 %v1337_v7 }
  0x44   : > { %1225 = vmatprep.subr.bf16.mxu0 %v1338_v8 }
  0x4b   : > { %1226 = vmatpush3.bf16.xpose.msra.mxu0 %v1338_v8 }
  0x52   : > { %1228 = vmatmul.mubr.bf16.vlgmr.msra.gmra.mrb[0].mxu0 %v1525_v9 }
  0x53   : > { %1231 = vmatprep.mubr.bf16.mxu0 %v1528_v10 }
  0x5a   : > { %1232 = vmatmul.mubr.bf16.gmra.mrb[4].mxu0 %v1533_v11 }
  0x5b   : > { %1235 = vmatprep.mubr.bf16.mxu0 %v1536_v12 }
  0x62   : > { %1236 = vmatmul.mubr.bf16.gmra.mrb[8].mxu0 %v1541_v13 }
  0x63   : > { %1239 = vmatprep.mubr.bf16.mxu0 %v1544_v14 }
  0x6a   : > { %1240 = vmatmul.mubr.bf16.gmra.mrb[12].mxu0 %v1549_v15 }
 0x125   : > { %v1229_v16 = vpop.f32.mrb[0].mxu0 }
 0x126   : > { %v512_v18 = vmul.f32 0.17677669, %v1229_v16  ;;  %v447_v19 = vpop.f32.mrb[1].mxu0 }
 0x127   : > { %v510_v20 = vmul.f32 0.17677669, %v447_v19  ;;  %v1230_v21 = vpop.f32.mrb[2].mxu0 }
 0x128   : > { %v513_v22 = vmul.f32 0.17677669, %v1230_v21  ;;  %v450_v23 = vpop.f32.mrb[3].mxu0  ;;  %v1555_v24 = vadd.f32 %v1148_v17, %v512_v18 }
 0x129   : > { %v511_v25 = vmul.f32 0.17677669, %v450_v23  ;;  %v533_v26 = vadd.f32 %v1148_v17, %v510_v20 }
 0x12a   : > { %553 = vmax.xlane.f32.xlu1 %v1555_v24  ;;  %v1558_v27 = vadd.f32 %v1148_v17, %v513_v22 }
 0x12b   : > { %549 = vmax.xlane.f32.xlu0 %v533_v26  ;;  %v534_v29 = vadd.f32 %v1148_v17, %v511_v25 }
 0x12d   : > { %v1233_v28 = vpop.f32.mrb[4].mxu0 }
 0x12e   : > { %555 = vmax.xlane.f32.xlu1 %v1558_v27  ;;  %v463_v30 = vpop.f32.mrb[5].mxu0  ;;  %v516_v34 = vmul.f32 0.17677669, %v1233_v28 }
 0x12f   : > { %v514_v31 = vmul.f32 0.17677669, %v463_v30  ;;  %551 = vmax.xlane.f32.xlu0 %v534_v29  ;;  %v1234_v32 = vpop.f32.mrb[6].mxu0 }
 0x130   : > { %v466_v33 = vpop.f32.mrb[7].mxu0  ;;  %v517_v37 = vmul.f32 0.17677669, %v1234_v32  ;;  %v539_v40 = vadd.f32 %v1148_v17, %v516_v34 }
 0x131   : > { %v515_v35 = vmul.f32 0.17677669, %v466_v33  ;;  %v537_v36 = vadd.f32 %v1148_v17, %v514_v31 }
 0x132   : > { %v1561_v44 = vadd.f32 %v1148_v17, %v517_v37 }
 0x133   : > { %557 = vmax.xlane.f32.xlu0 %v537_v36  ;;  %v538_v38 = vadd.f32 %v1148_v17, %v515_v35 }
 0x135   : > { %559 = vmax.xlane.f32.xlu1 %v538_v38  ;;  %v1237_v39 = vpop.f32.mrb[8].mxu0 }
 0x136   : > { %v479_v41 = vpop.f32.mrb[9].mxu0  ;;  %v520_v46 = vmul.f32 0.17677669, %v1237_v39 }
 0x137   : > { %v518_v42 = vmul.f32 0.17677669, %v479_v41  ;;  %561 = vmax.xlane.f32.xlu0 %v539_v40  ;;  %v1238_v43 = vpop.f32.mrb[10].mxu0 }
 0x138   : > { %v482_v45 = vpop.f32.mrb[11].mxu0  ;;  %v521_v49 = vmul.f32 0.17677669, %v1238_v43  ;;  %v1570_v52 = vadd.f32 %v1148_v17, %v520_v46 }
 0x139   : > { %v519_v47 = vmul.f32 0.17677669, %v482_v45  ;;  %563 = vmax.xlane.f32.xlu1 %v1561_v44  ;;  %v1564_v48 = vadd.f32 %v1148_v17, %v518_v42 }
 0x13a   : > { %v1573_v56 = vadd.f32 %v1148_v17, %v521_v49 }
 0x13b   : > { %565 = vmax.xlane.f32.xlu0 %v1564_v48  ;;  %v1567_v50 = vadd.f32 %v1148_v17, %v519_v47 }
 0x13d   : > { %567 = vmax.xlane.f32.xlu1 %v1567_v50  ;;  %v1241_v51 = vpop.f32.mrb[12].mxu0 }
 0x13e   : > { %v495_v53 = vpop.f32.mrb[13].mxu0  ;;  %v524_v58 = vmul.f32 0.17677669, %v1241_v51 }
 0x13f   : > { %v522_v54 = vmul.f32 0.17677669, %v495_v53  ;;  %569 = vmax.xlane.f32.xlu0 %v1570_v52  ;;  %v1242_v55 = vpop.f32.mrb[14].mxu0 }
 0x140   : > { %v498_v57 = vpop.f32.mrb[15].mxu0  ;;  %v525_v61 = vmul.f32 0.17677669, %v1242_v55  ;;  %v1582_v63 = vadd.f32 %v1148_v17, %v524_v58 }
 0x141   : > { %v523_v59 = vmul.f32 0.17677669, %v498_v57  ;;  %571 = vmax.xlane.f32.xlu1 %v1573_v56  ;;  %v1576_v60 = vadd.f32 %v1148_v17, %v522_v54 }
 0x142   : > { %v1585_v0 = vadd.f32 %v1148_v17, %v525_v61 }
 0x143   : > { %573 = vmax.xlane.f32.xlu0 %v1576_v60  ;;  %v1579_v62 = vadd.f32 %v1148_v17, %v523_v59 }
 0x145   : > { %575 = vmax.xlane.f32.xlu1 %v1579_v62 }
 0x147   : > { %577 = vmax.xlane.f32.xlu0 %v1582_v63 }
 0x149   : > { %579 = vmax.xlane.f32.xlu1 %v1585_v0 }
 0x1b7   : > { %v554_v1 = vpop.xlane.xlu1 %553 }
 0x1b8   : > { %v583_v2 = vsub.f32 %v1555_v24, %v554_v1  ;;  %v550_v4 = vpop.xlane.xlu0 %549 }
 0x1b9   : > { %v581_v5 = vsub.f32 %v533_v26, %v550_v4 }
 0x1ba   : > { %v601_v8 = vmul.f32 1.442695, %v583_v2 }
 0x1bb   : > { %v597_v6 = vmul.f32 1.442695, %v581_v5  ;;  %v556_v7 = vpop.xlane.xlu1 %555 }
 0x1bc   : > { %v584_v16 = vsub.f32 %v1558_v27, %v556_v7  ;;  %v552_v18 = vpop.xlane.xlu0 %551 }
 0x1bd   : > { %1363 = vpow2.f32 %v597_v6  ;;  %v582_v19 = vsub.f32 %v534_v29, %v552_v18  ;;  %v1347_v18 = vld [vmem:[%s1740_s3] sm:$0xff]  }
 0x1be   : > { %1365 = vpow2.f32 %v601_v8  ;;  %v603_v21 = vmul.f32 1.442695, %v584_v16  ;;  %1275 = vmatprep.subr.bf16.mxu1 %v1347_v18 }
 0x1bf   : > { %v599_v20 = vmul.f32 1.442695, %v582_v19 }
 0x1c0   : > { %v558_v17 = vpop.xlane.xlu0 %557 }
 0x1c1   : > { %1367 = vpow2.f32 %v599_v20  ;;  %v585_v22 = vsub.f32 %v537_v36, %v558_v17 }
 0x1c2   : > { %v560_v23 = vpop.xlane.xlu1 %559  ;;  %1369 = vpow2.f32 %v603_v21 }
 0x1c3   : > { %v605_v25 = vmul.f32 1.442695, %v585_v22  ;;  %v586_v28 = vsub.f32 %v538_v38, %v560_v23 }
 0x1c4   : > { %v562_v24 = vpop.xlane.xlu0 %561 }
 0x1c5   : > { %1371 = vpow2.f32 %v605_v25  ;;  %v607_v26 = vmul.f32 1.442695, %v586_v28  ;;  %v587_v30 = vsub.f32 %v539_v40, %v562_v24 }
 0x1c6   : > { %v564_v31 = vpop.xlane.xlu1 %563 }
 0x1c7   : > { %v1590_v32 = vpop.eup %1363  ;;  %v609_v27 = vmul.f32 1.442695, %v587_v30  ;;  %v588_v29 = vsub.f32 %v1561_v44, %v564_v31  ;;  %1373 = vpow2.f32 %v607_v26 }
 0x1c8   : > { %v566_v33 = vpop.xlane.xlu0 %565  ;;  %629 = vadd.xlane.f32.xlu0 %v1590_v32  ;;  %v1595_v36 = vpop.eup %1365 }
 0x1c9   : > { %1375 = vpow2.f32 %v609_v27  ;;  %v611_v34 = vmul.f32 1.442695, %v588_v29  ;;  %v589_v35 = vsub.f32 %v1564_v48, %v566_v33 }
 0x1ca   : > { %v568_v37 = vpop.xlane.xlu1 %567 }
 0x1cb   : > { %v1597_v38 = vpop.eup %1367  ;;  %v613_v39 = vmul.f32 1.442695, %v589_v35  ;;  %v590_v40 = vsub.f32 %v1567_v50, %v568_v37  ;;  %1377 = vpow2.f32 %v611_v34 }
 0x1cc   : > { %v570_v41 = vpop.xlane.xlu0 %569  ;;  %633 = vadd.xlane.f32.xlu0 %v1595_v36  ;;  %631 = vadd.xlane.f32.xlu1 %v1597_v38  ;;  %v1603_v44 = vpop.eup %1369 }
 0x1cd   : > { %1379 = vpow2.f32 %v613_v39  ;;  %v615_v42 = vmul.f32 1.442695, %v590_v40  ;;  %v591_v43 = vsub.f32 %v1570_v52, %v570_v41 }
 0x1ce   : > { %v572_v45 = vpop.xlane.xlu1 %571 }
 0x1cf   : > { %v1605_v46 = vpop.eup %1371  ;;  %v617_v47 = vmul.f32 1.442695, %v591_v43  ;;  %v592_v48 = vsub.f32 %v1573_v56, %v572_v45  ;;  %1381 = vpow2.f32 %v615_v42 }
 0x1d0   : > { %637 = vadd.xlane.f32.xlu0 %v1605_v46  ;;  %v574_v49 = vpop.xlane.xlu0 %573  ;;  %635 = vadd.xlane.f32.xlu1 %v1603_v44 }
 0x1d1   : > { %1383 = vpow2.f32 %v617_v47  ;;  %v619_v50 = vmul.f32 1.442695, %v592_v48  ;;  %v593_v51 = vsub.f32 %v1576_v60, %v574_v49  ;;  %v1611_v53 = vpop.eup %1373 }
 0x1d2   : > { %v576_v52 = vpop.xlane.xlu1 %575 }
 0x1d3   : > { %v1613_v54 = vpop.eup %1375  ;;  %v621_v55 = vmul.f32 1.442695, %v593_v51  ;;  %v594_v57 = vsub.f32 %v1579_v62, %v576_v52  ;;  %1385 = vpow2.f32 %v619_v50 }
 0x1d4   : > { %641 = vadd.xlane.f32.xlu0 %v1613_v54  ;;  %v578_v56 = vpop.xlane.xlu0 %577  ;;  %639 = vadd.xlane.f32.xlu1 %v1611_v53 }
 0x1d5   : > { %1387 = vpow2.f32 %v621_v55  ;;  %v623_v58 = vmul.f32 1.442695, %v594_v57  ;;  %v595_v59 = vsub.f32 %v1582_v63, %v578_v56  ;;  %v1619_v61 = vpop.eup %1377  ;;  %v1350_v56 = vld [vmem:[%s1740_s3 + $0x18] sm:$0xff]  }
 0x1d6   : > { %v580_v60 = vpop.xlane.xlu1 %579 }
 0x1d7   : > { %v1621_v1 = vpop.eup %1379  ;;  %v625_v2 = vmul.f32 1.442695, %v595_v59  ;;  %v596_v4 = vsub.f32 %v1585_v0, %v580_v60  ;;  %1389 = vpow2.f32 %v623_v58 }
 0x1d8   : > { %645 = vadd.xlane.f32.xlu0 %v1621_v1  ;;  %643 = vadd.xlane.f32.xlu1 %v1619_v61 }
 0x1d9   : > { %1391 = vpow2.f32 %v625_v2  ;;  %v627_v62 = vmul.f32 1.442695, %v596_v4  ;;  %v1626_v5 = vpop.eup %1381  ;;  %v1351_v4 = vld [vmem:[%s1740_s3 + $0x20] sm:$0xff]  }
 0x1db   : > { %v1628_v6 = vpop.eup %1383  ;;  %1393 = vpow2.f32 %v627_v62 }
 0x1dc   : > { %649 = vadd.xlane.f32.xlu0 %v1628_v6  ;;  %647 = vadd.xlane.f32.xlu1 %v1626_v5 }
 0x1dd   : > { %v1632_v63 = vpop.eup %1385 }
 0x1df   : > { %v1634_v7 = vpop.eup %1387 }
 0x1e0   : > { %653 = vadd.xlane.f32.xlu0 %v1634_v7  ;;  %651 = vadd.xlane.f32.xlu1 %v1632_v63 }
 0x1e1   : > { %v1638_v0 = vpop.eup %1389 }
 0x1e3   : > { %v1640_v8 = vpop.eup %1391 }
 0x1e4   : > { %657 = vadd.xlane.f32.xlu0 %v1640_v8  ;;  %655 = vadd.xlane.f32.xlu1 %v1638_v0 }
 0x1e5   : > { %v1644_v16 = vpop.eup %1393 }
 0x1e8   : > { %659 = vadd.xlane.f32.xlu1 %v1644_v16 }
 0x255   : > { %v630_v19 = vpop.xlane.xlu0 %629 }
 0x256   : > { %1395 = vrcp.f32 %v630_v19 }
 0x259   : > { %v634_v20 = vpop.xlane.xlu0 %633  ;;  %v632_v21 = vpop.xlane.xlu1 %631 }
 0x25a   : > { %1397 = vrcp.f32 %v632_v21 }
 0x25b   : > { %1399 = vrcp.f32 %v634_v20 }
 0x25d   : > { %v638_v17 = vpop.xlane.xlu0 %637  ;;  %v636_v22 = vpop.xlane.xlu1 %635 }
 0x25e   : > { %1401 = vrcp.f32 %v636_v22 }
 0x25f   : > { %1403 = vrcp.f32 %v638_v17 }
 0x260   : > { %v1396_v28 = vpop.eup %1395 }
 0x261   : > { %v642_v23 = vpop.xlane.xlu0 %641  ;;  %v640_v25 = vpop.xlane.xlu1 %639  ;;  %v677_v31 = vmul.f32 %v1396_v28, %v1590_v32  ;;  %v1348_v32 = vld [vmem:[%s1740_s3 + $0x8] sm:$0xff]  }
 0x262   : > { %1405 = vrcp.f32 %v640_v25 }
 0x263   : > { %1407 = vrcp.f32 %v642_v23 }
 0x264   : > { %v1398_v24 = vpop.eup %1397 }
 0x265   : > { %v646_v26 = vpop.xlane.xlu0 %645  ;;  %v644_v30 = vpop.xlane.xlu1 %643  ;;  %v678_v27 = vmul.f32 %v1398_v24, %v1597_v38 }
 0x266   : > { %v1400_v29 = vpop.eup %1399  ;;  %1409 = vrcp.f32 %v644_v30  ;;  %v799_v30 = vunpack.c.h.bf16 %v1516_v3 }
 0x267   : > { %v693_v33 = vpack.c.bf16 %v678_v27, %v677_v31  ;;  %1411 = vrcp.f32 %v646_v26  ;;  %v679_v39 = vmul.f32 %v1400_v29, %v1595_v36  ;;  %v1353_v26 = vld [vmem:[%s1740_s3 + $0x30] sm:$0xff]  }
 0x268   : > { %v1402_v34 = vpop.eup %1401 }
 0x269   : > { %v650_v35 = vpop.xlane.xlu0 %649  ;;  %v648_v37 = vpop.xlane.xlu1 %647  ;;  %1259 = vmatprep.mubr.bf16.mxu1 %v693_v33  ;;  %v680_v40 = vmul.f32 %v1402_v34, %v1603_v44  ;;  %v1349_v44 = vld [vmem:[%s1740_s3 + $0x10] sm:$0xff]  }
 0x26a   : > { %v1404_v41 = vpop.eup %1403  ;;  %1413 = vrcp.f32 %v648_v37 }
 0x26b   : > { %v694_v42 = vpack.c.bf16 %v680_v40, %v679_v39  ;;  %1415 = vrcp.f32 %v650_v35  ;;  %v681_v47 = vmul.f32 %v1404_v41, %v1605_v46 }
 0x26c   : > { %v1406_v38 = vpop.eup %1405 }
 0x26d   : > { %v654_v43 = vpop.xlane.xlu0 %653  ;;  %v652_v45 = vpop.xlane.xlu1 %651  ;;  %1260 = vmatmul.mubr.bf16.vlgmr.msra.gmra.mrb[0].mxu1 %v694_v42  ;;  %v682_v48 = vmul.f32 %v1406_v38, %v1611_v53  ;;  %v804_v42 = vunpack.c.l.bf16 %v1533_v11 }
 0x26e   : > { %v1408_v49 = vpop.eup %1407  ;;  %1417 = vrcp.f32 %v652_v45  ;;  %1276 = vmatpush3.bf16.msra.mxu1 %v1347_v18 }
 0x26f   : > { %v695_v36 = vpack.c.bf16 %v682_v48, %v681_v47  ;;  %1277 = vmatprep.subr.bf16.mxu1 %v1348_v32  ;;  %1419 = vrcp.f32 %v654_v43  ;;  %v683_v55 = vmul.f32 %v1408_v49, %v1613_v54 }
 0x270   : > { %v1410_v50 = vpop.eup %1409 }
 0x271   : > { %v658_v51 = vpop.xlane.xlu0 %657  ;;  %v656_v52 = vpop.xlane.xlu1 %655  ;;  %1263 = vmatprep.mubr.bf16.mxu1 %v695_v36  ;;  %v684_v46 = vmul.f32 %v1410_v50, %v1619_v61 }
 0x272   : > { %v1412_v57 = vpop.eup %1411  ;;  %1421 = vrcp.f32 %v656_v52  ;;  %1278 = vmatpush3.bf16.msra.mxu1 %v1348_v32  ;;  %v805_v32 = vunpack.c.h.bf16 %v1533_v11  ;;  %v808_v52 = vunpack.c.l.bf16 %v1541_v13  ;;  %v809_v11 = vunpack.c.h.bf16 %v1541_v13 }
 0x273   : > { %1423 = vrcp.f32 %v658_v51  ;;  %v696_v53 = vpack.c.bf16 %v684_v46, %v683_v55  ;;  %1279 = vmatprep.subr.bf16.mxu1 %v1349_v44  ;;  %v685_v60 = vmul.f32 %v1412_v57, %v1621_v1  ;;  %v1352_v1 = vld [vmem:[%s1740_s3 + $0x28] sm:$0xff]   ;;  %v806_v46 = vunpack.c.l.bf16 %v1536_v12 }
 0x274   : > { %v1414_v58 = vpop.eup %1413  ;;  %v813_v13 = vunpack.c.h.bf16 %v1549_v15 }
 0x275   : > { %v660_v59 = vpop.xlane.xlu1 %659  ;;  %1264 = vmatmul.mubr.bf16.gmra.mrb[4].mxu1 %v696_v53  ;;  %v686_v54 = vmul.f32 %v1414_v58, %v1626_v5  ;;  %v1416_v2 = vpop.eup %1415 }
 0x276   : > { %1425 = vrcp.f32 %v660_v59  ;;  %1280 = vmatpush3.bf16.msra.mxu1 %v1349_v44  ;;  %v687_v18 = vmul.f32 %v1416_v2, %v1628_v6 }
 0x277   : > { %v697_v61 = vpack.c.bf16 %v686_v54, %v685_v60  ;;  %1281 = vmatprep.subr.bf16.mxu1 %v1350_v56 }
 0x278   : > { %v1418_v62 = vpop.eup %1417 }
 0x279   : > { %1267 = vmatprep.mubr.bf16.mxu1 %v697_v61  ;;  %v688_v19 = vmul.f32 %v1418_v62, %v1632_v63  ;;  %v1420_v20 = vpop.eup %1419 }
 0x27a   : > { %1282 = vmatpush3.bf16.msra.mxu1 %v1350_v56  ;;  %v689_v22 = vmul.f32 %v1420_v20, %v1634_v7  ;;  %v1354_v7 = vld [vmem:[%s1740_s3 + $0x38] sm:$0xff]  }
 0x27b   : > { %v698_v21 = vpack.c.bf16 %v688_v19, %v687_v18  ;;  %1283 = vmatprep.subr.bf16.mxu1 %v1351_v4  ;;  %v810_v18 = vunpack.c.l.bf16 %v1544_v14 }
 0x27c   : > { %v1422_v5 = vpop.eup %1421 }
 0x27d   : > { %v1424_v17 = vpop.eup %1423  ;;  %1268 = vmatmul.mubr.bf16.gmra.mrb[8].mxu1 %v698_v21  ;;  %v690_v23 = vmul.f32 %v1422_v5, %v1638_v0  ;;  %v798_v0 = vunpack.c.l.bf16 %v1516_v3  ;;  %v803_v3 = vunpack.c.h.bf16 %v1528_v10 }
 0x27e   : > { %1284 = vmatpush3.bf16.msra.mxu1 %v1351_v4  ;;  %v691_v63 = vmul.f32 %v1424_v17, %v1640_v8  ;;  %v800_v8 = vunpack.c.l.bf16 %v1525_v9  ;;  %v812_v4 = vunpack.c.l.bf16 %v1549_v15  ;;  %v1149_v15 = vld [vmem:[%s1741_s4] ss:$0 sm:$0xff] }
 0x27f   : > { %v699_v6 = vpack.c.bf16 %v690_v23, %v689_v22  ;;  %1285 = vmatprep.subr.bf16.mxu1 %v1352_v1 }
 0x280   : > { %v1426_v25 = vpop.eup %1425 }
 0x281   : > { %v692_v28 = vmul.f32 %v1426_v25, %v1644_v16  ;;  %1271 = vmatprep.mubr.bf16.mxu1 %v699_v6  ;;  %v801_v16 = vunpack.c.h.bf16 %v1525_v9  ;;  %v802_v9 = vunpack.c.l.bf16 %v1528_v10  ;;  %v807_v10 = vunpack.c.h.bf16 %v1536_v12 }
 0x282   : > { %1286 = vmatpush3.bf16.msra.mxu1 %v1352_v1  ;;  %v811_v12 = vunpack.c.h.bf16 %v1544_v14 }
 0x283   : > { %v700_v24 = vpack.c.bf16 %v692_v28, %v691_v63  ;;  %1287 = vmatprep.subr.bf16.mxu1 %v1353_v26 }
 0x285   : > { %1272 = vmatmul.mubr.bf16.gmra.mrb[12].mxu1 %v700_v24 }
 0x286   : > { %1288 = vmatpush3.bf16.msra.mxu1 %v1353_v26 }
 0x287   : > { %1289 = vmatprep.subr.bf16.mxu1 %v1354_v7 }
 0x28a   : > { %1290 = vmatpush3.bf16.msra.mxu1 %v1354_v7 }
 0x340   : > { %v1261_v31 = vpop.f32.mrb[0].mxu1 }
 0x341   : > { %v735_v27 = vpop.f32.mrb[1].mxu1  ;;  %v816_v34 = vadd.f32 %v1261_v31, %v800_v8 }
 0x342   : > { %v814_v29 = vadd.f32 %v798_v0, %v735_v27  ;;  %v1262_v33 = vpop.f32.mrb[2].mxu1 }
 0x343   : > { %v817_v35 = vadd.f32 %v1262_v33, %v801_v16  ;;  %v738_v37 = vpop.f32.mrb[3].mxu1 }
 0x344   : > { %v815_v39 = vadd.f32 %v799_v30, %v738_v37 }
 0x345   : > { %v831_v40 = vpack.c.bf16 %v817_v35, %v816_v34 }
 0x346   : > { %v830_v41 = vpack.c.bf16 %v815_v39, %v814_v29 }
 0x348   : > { %v1265_v38 = vpop.f32.mrb[4].mxu1  ;;  %1291 = vmatprep.mubr.bf16.mxu1 %v830_v41 }
 0x349   : > { %v751_v43 = vpop.f32.mrb[5].mxu1  ;;  %1292 = vmatmul.mubr.bf16.vlgmr.msra.gmra.mrb[16].mxu1 %v831_v40  ;;  %v820_v47 = vadd.f32 %v1265_v38, %v804_v42 }
 0x34a   : > { %v1266_v45 = vpop.f32.mrb[6].mxu1  ;;  %v818_v36 = vadd.f32 %v802_v9, %v751_v43 }
 0x34b   : > { %v821_v48 = vadd.f32 %v1266_v45, %v805_v32  ;;  %v754_v49 = vpop.f32.mrb[7].mxu1 }
 0x34c   : > { %v819_v44 = vadd.f32 %v803_v3, %v754_v49 }
 0x34d   : > { %v833_v50 = vpack.c.bf16 %v821_v48, %v820_v47 }
 0x34e   : > { %v832_v51 = vpack.c.bf16 %v819_v44, %v818_v36 }
 0x350   : > { %v1269_v55 = vpop.f32.mrb[8].mxu1  ;;  %1295 = vmatprep.mubr.bf16.mxu1 %v832_v51 }
 0x351   : > { %v767_v57 = vpop.f32.mrb[9].mxu1  ;;  %1296 = vmatmul.mubr.bf16.gmra.mrb[20].mxu1 %v833_v50  ;;  %v824_v56 = vadd.f32 %v1269_v55, %v808_v52 }
 0x352   : > { %v1270_v53 = vpop.f32.mrb[10].mxu1  ;;  %v822_v60 = vadd.f32 %v806_v46, %v767_v57 }
 0x353   : > { %v825_v58 = vadd.f32 %v1270_v53, %v809_v11  ;;  %v770_v59 = vpop.f32.mrb[11].mxu1 }
 0x354   : > { %v823_v54 = vadd.f32 %v807_v10, %v770_v59 }
 0x355   : > { %v835_v2 = vpack.c.bf16 %v825_v58, %v824_v56 }
 0x356   : > { %v834_v61 = vpack.c.bf16 %v823_v54, %v822_v60 }
 0x358   : > { %v1273_v62 = vpop.f32.mrb[12].mxu1  ;;  %1299 = vmatprep.mubr.bf16.mxu1 %v834_v61 }
 0x359   : > { %v783_v19 = vpop.f32.mrb[13].mxu1  ;;  %1300 = vmatmul.mubr.bf16.gmra.mrb[24].mxu1 %v835_v2  ;;  %v828_v21 = vadd.f32 %v1273_v62, %v812_v4 }
 0x35a   : > { %v1274_v20 = vpop.f32.mrb[14].mxu1  ;;  %v826_v17 = vadd.f32 %v810_v18, %v783_v19 }
 0x35b   : > { %v829_v1 = vadd.f32 %v1274_v20, %v813_v13  ;;  %v786_v5 = vpop.f32.mrb[15].mxu1 }
 0x35c   : > { %v827_v22 = vadd.f32 %v811_v12, %v786_v5 }
 0x35d   : > { %v837_v23 = vpack.c.bf16 %v829_v1, %v828_v21 }
 0x35e   : > { %v836_v25 = vpack.c.bf16 %v827_v22, %v826_v17 }
 0x360   : > { %1303 = vmatprep.mubr.bf16.mxu1 %v836_v25 }
 0x361   : > { %1304 = vmatmul.mubr.bf16.gmra.mrb[28].mxu1 %v837_v23 }
 0x41c   : > { %v1293_v14 = vpop.f32.mrb[16].mxu1 }
 0x41d   : > { %v952_v6 = vadd.f32 %v1293_v14, %v1149_v15  ;;  %v943_v63 = vpop.f32.mrb[17].mxu1 }
 0x41e   : > { %v944_v28 = vadd.f32 %v1149_v15, %v943_v63  ;;  %v1294_v24 = vpop.f32.mrb[18].mxu1 }
 0x41f   : > { %1008 = vst [vmem:[%s1710_s6 + $0x10] sm:$0xff] %v952_v6  ;;  %v955_v26 = vadd.f32 %v1294_v24, %v1149_v15  ;;  %v946_v7 = vpop.f32.mrb[19].mxu1 }
 0x420   : > { %1006 = vst [vmem:[%s1710_s6] sm:$0xff] %v944_v28  ;;  %v947_v0 = vadd.f32 %v1149_v15, %v946_v7 }
 0x421   : > { %1009 = vst [vmem:[%s1710_s6 + $0x18] sm:$0xff] %v955_v26 }
 0x422   : > { %1007 = vst [vmem:[%s1710_s6 + $0x8] sm:$0xff] %v947_v0 }
 0x424   : > { %v1297_v8 = vpop.f32.mrb[20].mxu1 }
 0x425   : > { %v968_v16 = vadd.f32 %v1297_v8, %v1149_v15  ;;  %v959_v30 = vpop.f32.mrb[21].mxu1 }
 0x426   : > { %v960_v31 = vadd.f32 %v1149_v15, %v959_v30  ;;  %v1298_v27 = vpop.f32.mrb[22].mxu1 }
 0x427   : > { %1012 = vst [vmem:[%s1710_s6 + $0x30] sm:$0xff] %v968_v16  ;;  %v971_v29 = vadd.f32 %v1298_v27, %v1149_v15  ;;  %v962_v33 = vpop.f32.mrb[23].mxu1 }
 0x428   : > { %1010 = vst [vmem:[%s1710_s6 + $0x20] sm:$0xff] %v960_v31  ;;  %v963_v34 = vadd.f32 %v1149_v15, %v962_v33 }
 0x429   : > { %1013 = vst [vmem:[%s1710_s6 + $0x38] sm:$0xff] %v971_v29 }
 0x42a   : > { %1011 = vst [vmem:[%s1710_s6 + $0x28] sm:$0xff] %v963_v34 }
 0x42c   : > { %v1301_v35 = vpop.f32.mrb[24].mxu1 }
 0x42d   : > { %v984_v37 = vadd.f32 %v1301_v35, %v1149_v15  ;;  %v975_v39 = vpop.f32.mrb[25].mxu1 }
 0x42e   : > { %v976_v40 = vadd.f32 %v1149_v15, %v975_v39  ;;  %v1302_v41 = vpop.f32.mrb[26].mxu1 }
 0x42f   : > { %1016 = vst [vmem:[%s1710_s6 + $0x50] sm:$0xff] %v984_v37  ;;  %v987_v42 = vadd.f32 %v1302_v41, %v1149_v15  ;;  %v978_v32 = vpop.f32.mrb[27].mxu1 }
 0x430   : > { %1014 = vst [vmem:[%s1710_s6 + $0x40] sm:$0xff] %v976_v40  ;;  %v979_v38 = vadd.f32 %v1149_v15, %v978_v32 }
 0x431   : > { %1017 = vst [vmem:[%s1710_s6 + $0x58] sm:$0xff] %v987_v42 }
 0x432   : > { %1015 = vst [vmem:[%s1710_s6 + $0x48] sm:$0xff] %v979_v38 }
 0x434   : > { %v1305_v9 = vpop.f32.mrb[28].mxu1 }
 0x435   : > { %v1000_v3 = vadd.f32 %v1305_v9, %v1149_v15  ;;  %v991_v43 = vpop.f32.mrb[29].mxu1 }
 0x436   : > { %v992_v45 = vadd.f32 %v1149_v15, %v991_v43  ;;  %v1306_v47 = vpop.f32.mrb[30].mxu1 }
 0x437   : > { %1020 = vst [vmem:[%s1710_s6 + $0x70] sm:$0xff] %v1000_v3  ;;  %v1003_v48 = vadd.f32 %v1306_v47, %v1149_v15  ;;  %v994_v49 = vpop.f32.mrb[31].mxu1 }
 0x438   : > { %1018 = vst [vmem:[%s1710_s6 + $0x60] sm:$0xff] %v992_v45  ;;  %v995_v36 = vadd.f32 %v1149_v15, %v994_v49 }
 0x439   : > { %1021 = vst [vmem:[%s1710_s6 + $0x78] sm:$0xff] %v1003_v48 }
 0x43a   : > { %1019 = vst [vmem:[%s1710_s6 + $0x68] sm:$0xff] %v995_v36 }
 0x43b PF: > { %s15_s20 = sadd.s32 1, %s1449_s20   ;;  %s1743_s18 = smov %s1445_s19 }
 0x43c   : > { %p12_p5 = scmp.ge.s32.totalorder %s15_s20, 4   ;;  %s1744_s19 = smov %s1746_s21 }
 0x43e   :  { %14 = sbr.rel (!%p12_p5) target bundleno = 2 (0x2), region = 73 }

</bundles_post_ra>
